<compile_context>
chip_gen: v6e
topology: v6e:2x2x1
jax: 0.10.0
libtpu: 0.0.40
codegen_flags: <defaults>
</compile_context>

<pallas_src>
import functools

import jax
import jax.numpy as jnp
import numpy as np
from jax import lax
from jax.experimental import pallas as pl
from jax.experimental.pallas import tpu as pltpu

NEG_SLOPE = 0.2   # GATConv default negative_slope
MASK_VAL = -1e30


# ----------------------------- Pallas kernels ------------------------------ #
def _project_kernel(x_ref, w_ref, vsrc_ref, vdst_ref,
                    hh_ref, ssrc_ref, sdst_ref, *, heads, out_c):
    """Per row tile: h = x @ W (head-major) + per-node logit contributions."""
    x = x_ref[...]                                   # [TM, F_in]
    w = w_ref[...]                                   # [F_in, H*C]

    h = jnp.dot(x, w, preferred_element_type=jnp.float32)   # [TM, H*C]

    # Head-major reorganisation ONCE per node (hoisted out of the O(N^2)
    # attention kernel, which then only does cheap leading-axis indexing).
    for hd in range(heads):
        hh_ref[hd] = h[:, hd * out_c:(hd + 1) * out_c]       # [TM, C]

    # Attention logit contributions with folded weights:
    #   s_src[h, j] = att_src[h] . (x[j] @ W)_h == x[j] @ (W_h @ att_src[h])
    # -> length-F_in contractions instead of rank-deficient [N,N] matmuls.
    dn = (((1,), (1,)), ((), ()))                    # contract last dims (a @ b^T)
    ssrc_ref[...] = lax.dot_general(vsrc_ref[...], x, dn,
                                    preferred_element_type=jnp.float32)   # [H, TM]
    sdst_ref[...] = jnp.dot(x, vdst_ref[...],
                            preferred_element_type=jnp.float32)           # [TM, H]


def _attn_kernel(ssrc_ref, sdst_ref, hh_ref, bias_ref, adj_ref, out_ref,
                 *, heads, out_c, concat, apply_elu):
    """Per row tile: masked softmax over incoming edges + aggregation."""
    adj = adj_ref[...]                               # [TM, N] int8 (4x smaller DMA)
    # Additive edge mask, computed ONCE per tile and shared by all heads.
    mask_bias = jnp.where(adj > 0, 0.0, MASK_VAL)    # [TM, N] f32
    s_src = ssrc_ref[...]                            # [H, N]
    s_dst = sdst_ref[...]                            # [TM, H]
    bias = bias_ref[...]                             # [1, out_dim]

    acc = None
    for hd in range(heads):
        # e[i, j] = leakyrelu(s_dst[i] + s_src[j]) + mask  (pure VPU broadcast add)
        e = s_dst[:, hd:hd + 1] + s_src[hd:hd + 1, :]          # [TM, N]
        e = jnp.where(e > 0, e, NEG_SLOPE * e)
        e = e + mask_bias

        # softmax over incoming edges j (per target i)
        m = jnp.max(e, axis=1, keepdims=True)
        p = jnp.exp(e - m)
        denom = jnp.sum(p, axis=1, keepdims=True)
        alpha = p * pl.reciprocal(denom, approx=True)          # EUP slot, not VPU div

        # aggregate messages: out[i] = sum_j alpha[i, j] * h[j]
        agg = jnp.dot(alpha, hh_ref[hd],
                      preferred_element_type=jnp.float32)      # [TM, C]

        if concat:
            o = agg + bias[:, hd * out_c:(hd + 1) * out_c]
            if apply_elu:  # fused inter-layer ELU
                o = jnp.where(o > 0, o, jnp.exp(jnp.minimum(o, 0.0)) - 1.0)
            # direct per-head store; no head_outs list / concat relayout,
            # only one head's [TM, N] alpha live at a time.
            out_ref[:, hd * out_c:(hd + 1) * out_c] = o.astype(out_ref.dtype)
        else:
            acc = agg if acc is None else acc + agg

    if not concat:
        o = acc * (1.0 / heads) + bias               # mean over heads, then bias
        if apply_elu:
            o = jnp.where(o > 0, o, jnp.exp(jnp.minimum(o, 0.0)) - 1.0)
        out_ref[...] = o.astype(out_ref.dtype)


# ------------------------------ layer wrapper ------------------------------ #
def gat_conv_layer(x, w, att_src, att_dst, bias, adj, *, heads, out_c, concat,
                   apply_elu, tm=128):
    n, f_in = x.shape
    assert n % tm == 0, "N must be divisible by the row-tile size"
    grid = (n // tm,)
    out_dim = heads * out_c if concat else out_c
    cp = pltpu.CompilerParams(dimension_semantics=("parallel",))

    # Parameter-only preprocessing: fold attention vectors into W so the
    # kernels never need per-head [N,N] logit matmuls.
    w_r = w.reshape(f_in, heads, out_c)
    v_src_t = jnp.einsum("fhc,hc->hf", w_r, att_src)   # [H, F_in]
    v_dst = jnp.einsum("fhc,hc->fh", w_r, att_dst)     # [F_in, H]

    h_heads, s_src, s_dst = pl.pallas_call(
        functools.partial(_project_kernel, heads=heads, out_c=out_c),
        grid=grid,
        in_specs=[
            pl.BlockSpec((tm, f_in), lambda i: (i, 0)),              # x tile
            pl.BlockSpec((f_in, heads * out_c), lambda i: (0, 0)),   # W (resident)
            pl.BlockSpec((heads, f_in), lambda i: (0, 0)),           # folded att_src
            pl.BlockSpec((f_in, heads), lambda i: (0, 0)),           # folded att_dst
        ],
        out_specs=[
            pl.BlockSpec((heads, tm, out_c), lambda i: (0, i, 0)),   # h, head-major
            pl.BlockSpec((heads, tm), lambda i: (0, i)),             # s_src [H, N]
            pl.BlockSpec((tm, heads), lambda i: (i, 0)),             # s_dst [N, H]
        ],
        out_shape=[
            jax.ShapeDtypeStruct((heads, n, out_c), jnp.float32),
            jax.ShapeDtypeStruct((heads, n), jnp.float32),
            jax.ShapeDtypeStruct((n, heads), jnp.float32),
        ],
        compiler_params=cp,
    )(x, w, v_src_t, v_dst)

    out = pl.pallas_call(
        functools.partial(_attn_kernel, heads=heads, out_c=out_c,
                          concat=concat, apply_elu=apply_elu),
        grid=grid,
        in_specs=[
            pl.BlockSpec((heads, n), lambda i: (0, 0)),              # s_src (resident)
            pl.BlockSpec((tm, heads), lambda i: (i, 0)),             # s_dst tile
            pl.BlockSpec((heads, n, out_c), lambda i: (0, 0, 0)),    # h (resident)
            pl.BlockSpec((1, out_dim), lambda i: (0, 0)),            # bias
            pl.BlockSpec((tm, n), lambda i: (i, 0)),                 # adj tile (int8)
        ],
        out_specs=pl.BlockSpec((tm, out_dim), lambda i: (i, 0)),
        out_shape=jax.ShapeDtypeStruct((n, out_dim), jnp.float32),
        compiler_params=cp,
    )(s_src, s_dst, h_heads, bias, adj)
    return out


def edge_index_to_adj(edge_index, n):
    """int8 adj[i, j] = 1 iff edge j -> i; self loops added (add_self_loops)."""
    src, dst = edge_index[0], edge_index[1]
    adj = jnp.zeros((n, n), jnp.int8).at[dst, src].set(1)
    diag = jnp.arange(n)
    return adj.at[diag, diag].set(1)


def gat_l3_forward(x, adj, params, *, heads, hidden, out_c, tm=128):
    h = gat_conv_layer(x, params["w1"], params["att_src1"], params["att_dst1"],
                       params["b1"], adj, heads=heads, out_c=hidden,
                       concat=True, apply_elu=True, tm=tm)
    h = gat_conv_layer(h, params["w2"], params["att_src2"], params["att_dst2"],
                       params["b2"], adj, heads=heads, out_c=hidden,
                       concat=True, apply_elu=True, tm=tm)
    out = gat_conv_layer(h, params["w3"], params["att_src3"], params["att_dst3"],
                         params["b3"], adj, heads=1, out_c=out_c,
                         concat=False, apply_elu=False, tm=tm)
    return out


# -------------------------- pure-JAX reference ----------------------------- #
def _gat_layer_ref(x, w, att_src, att_dst, bias, adj, heads, out_c, concat,
                   apply_elu):
    n = x.shape[0]
    h = (x @ w).reshape(n, heads, out_c)
    a_src = jnp.einsum("nhc,hc->nh", h, att_src)
    a_dst = jnp.einsum("nhc,hc->nh", h, att_dst)
    e = a_dst[:, None, :] + a_src[None, :, :]
    e = jnp.where(e > 0, e, NEG_SLOPE * e)
    e = jnp.where(adj[:, :, None] > 0, e, MASK_VAL)
    alpha = jax.nn.softmax(e, axis=1)
    out = jnp.einsum("nmh,mhc->nhc", alpha, h)
    out = out.reshape(n, heads * out_c) if concat else out.mean(axis=1)
    out = out + bias.reshape(-1)
    if apply_elu:
        out = jnp.where(out > 0, out, jnp.exp(jnp.minimum(out, 0.0)) - 1.0)
    return out


def gat_l3_ref(x, adj, params, *, heads, hidden, out_c):
    h = _gat_layer_ref(x, params["w1"], params["att_src1"], params["att_dst1"],
                       params["b1"], adj, heads, hidden, True, True)
    h = _gat_layer_ref(h, params["w2"], params["att_src2"], params["att_dst2"],
                       params["b2"], adj, heads, hidden, True, True)
    return _gat_layer_ref(h, params["w3"], params["att_src3"], params["att_dst3"],
                          params["b3"], adj, 1, out_c, False, False)


# ---------------------------------- main ------------------------------------ #
if __name__ == "__main__":
    N, IN_C, HIDDEN, HEADS, OUT_C, TM = 256, 16, 8, 4, 8, 128

    key = jax.random.PRNGKey(0)
    ks = jax.random.split(key, 13)

    # node features
    x = jax.random.normal(ks[0], (N, IN_C), jnp.float32)

    # deterministic graph: bidirectional ring (edge_index [2, E], row0=src, row1=dst)
    src = jnp.arange(N, dtype=jnp.int32)
    dst = (src + 1) % N
    edge_index = jnp.stack([jnp.concatenate([src, dst]),
                            jnp.concatenate([dst, src])], axis=0)   # [2, 2N]
    adj = edge_index_to_adj(edge_index, N)

    def glorot(k, shape):
        fan_in, fan_out = shape[0], shape[-1]
        lim = (6.0 / (fan_in + fan_out)) ** 0.5
        return jax.random.uniform(k, shape, jnp.float32, -lim, lim)

    params = {
        # conv1: GATConv(IN_C -> HIDDEN, heads=HEADS, concat=True)
        "w1": glorot(ks[1], (IN_C, HEADS * HIDDEN)),
        "att_src1": glorot(ks[2], (HEADS, HIDDEN)),
        "att_dst1": glorot(ks[3], (HEADS, HIDDEN)),
        "b1": 0.01 * jax.random.normal(ks[4], (1, HEADS * HIDDEN), jnp.float32),
        # conv2: GATConv(HIDDEN*HEADS -> HIDDEN, heads=HEADS, concat=True)
        "w2": glorot(ks[5], (HEADS * HIDDEN, HEADS * HIDDEN)),
        "att_src2": glorot(ks[6], (HEADS, HIDDEN)),
        "att_dst2": glorot(ks[7], (HEADS, HIDDEN)),
        "b2": 0.01 * jax.random.normal(ks[8], (1, HEADS * HIDDEN), jnp.float32),
        # conv3: GATConv(HIDDEN*HEADS -> OUT_C, heads=1, concat=False)
        "w3": glorot(ks[9], (HEADS * HIDDEN, OUT_C)),
        "att_src3": glorot(ks[10], (1, OUT_C)),
        "att_dst3": glorot(ks[11], (1, OUT_C)),
        "b3": 0.01 * jax.random.normal(ks[12], (1, OUT_C), jnp.float32),
    }

    out = gat_l3_forward(x, adj, params, heads=HEADS, hidden=HIDDEN,
                         out_c=OUT_C, tm=TM)
    out = jax.block_until_ready(out)

    ref = gat_l3_ref(x, adj, params, heads=HEADS, hidden=HIDDEN, out_c=OUT_C)
    np.testing.assert_allclose(np.asarray(out), np.asarray(ref),
                               rtol=2e-2, atol=2e-2)
    assert out.shape == (N, OUT_C)
    print("KERNEL_OK")
</pallas_src>

<mosaic_0001>
module attributes {stable_mosaic.version = 11 : i64} {
  func.func @_project_kernel(%arg0: i32, %arg1: memref<128x16xf32, #tpu.memory_space<vmem>>, %arg2: memref<16x32xf32, #tpu.memory_space<vmem>>, %arg3: memref<4x16xf32, #tpu.memory_space<vmem>>, %arg4: memref<16x4xf32, #tpu.memory_space<vmem>>, %arg5: memref<4x128x8xf32, #tpu.memory_space<vmem>>, %arg6: memref<4x128xf32, #tpu.memory_space<vmem>>, %arg7: memref<128x4xf32, #tpu.memory_space<vmem>>) attributes {dimension_semantics = [#tpu.dimension_semantics<parallel>], iteration_bounds = array<i64: 2>, scalar_prefetch = 0 : i64, scratch_operands = 0 : i64, tpu.core_type = #tpu.core_type<tc>, window_params = [{transform_indices = @transform_0, window_bounds = array<i64: 128, 16>}, {pipeline_mode = #tpu.pipeline_mode<synchronous>, transform_indices = @transform_1, window_bounds = array<i64: 16, 32>}, {pipeline_mode = #tpu.pipeline_mode<synchronous>, transform_indices = @transform_2, window_bounds = array<i64: 4, 16>}, {pipeline_mode = #tpu.pipeline_mode<synchronous>, transform_indices = @transform_3, window_bounds = array<i64: 16, 4>}, {transform_indices = @transform_4, window_bounds = array<i64: 4, 128, 8>}, {transform_indices = @transform_5, window_bounds = array<i64: 4, 128>}, {transform_indices = @transform_6, window_bounds = array<i64: 128, 4>}]} {
    %c0 = arith.constant 0 : index
    %c0_0 = arith.constant 0 : index
    %0 = vector.load %arg1[%c0, %c0_0] : memref<128x16xf32, #tpu.memory_space<vmem>>, vector<128x16xf32>
    %c0_1 = arith.constant 0 : index
    %c0_2 = arith.constant 0 : index
    %1 = vector.load %arg2[%c0_1, %c0_2] : memref<16x32xf32, #tpu.memory_space<vmem>>, vector<16x32xf32>
    %cst = arith.constant dense<0.000000e+00> : vector<128x32xf32>
    %2 = tpu.matmul %0, %1, %cst {dimension_numbers = #tpu.dot_dimension_numbers<[1], [0], [0], [1], [0, 0, 1, 1], [], []>} : vector<128x16xf32>, vector<16x32xf32>, vector<128x32xf32> -> vector<128x32xf32>
    %3 = vector.extract_strided_slice %2 {offsets = [0, 0], sizes = [128, 8], strides = [1, 1]} : vector<128x32xf32> to vector<128x8xf32>
    %c0_3 = arith.constant 0 : index
    %c0_4 = arith.constant 0 : index
    %c0_5 = arith.constant 0 : index
    %4 = vector.load %arg5[%c0_3, %c0_4, %c0_5] : memref<4x128x8xf32, #tpu.memory_space<vmem>>, vector<1x128x8xf32>
    %5 = vector.shape_cast %4 : vector<1x128x8xf32> to vector<128x8xf32>
    %6 = vector.shape_cast %3 : vector<128x8xf32> to vector<1x128x8xf32>
    tpu.vector_store %arg5[%c0_3, %c0_4, %c0_5], %6 {strides = array<i32>} : memref<4x128x8xf32, #tpu.memory_space<vmem>>, vector<1x128x8xf32>,
    %7 = vector.extract_strided_slice %2 {offsets = [0, 8], sizes = [128, 8], strides = [1, 1]} : vector<128x32xf32> to vector<128x8xf32>
    %c1 = arith.constant 1 : index
    %c0_6 = arith.constant 0 : index
    %c0_7 = arith.constant 0 : index
    %8 = vector.load %arg5[%c1, %c0_6, %c0_7] : memref<4x128x8xf32, #tpu.memory_space<vmem>>, vector<1x128x8xf32>
    %9 = vector.shape_cast %8 : vector<1x128x8xf32> to vector<128x8xf32>
    %10 = vector.shape_cast %7 : vector<128x8xf32> to vector<1x128x8xf32>
    tpu.vector_store %arg5[%c1, %c0_6, %c0_7], %10 {strides = array<i32>} : memref<4x128x8xf32, #tpu.memory_space<vmem>>, vector<1x128x8xf32>,
    %11 = vector.extract_strided_slice %2 {offsets = [0, 16], sizes = [128, 8], strides = [1, 1]} : vector<128x32xf32> to vector<128x8xf32>
    %c2 = arith.constant 2 : index
    %c0_8 = arith.constant 0 : index
    %c0_9 = arith.constant 0 : index
    %12 = vector.load %arg5[%c2, %c0_8, %c0_9] : memref<4x128x8xf32, #tpu.memory_space<vmem>>, vector<1x128x8xf32>
    %13 = vector.shape_cast %12 : vector<1x128x8xf32> to vector<128x8xf32>
    %14 = vector.shape_cast %11 : vector<128x8xf32> to vector<1x128x8xf32>
    tpu.vector_store %arg5[%c2, %c0_8, %c0_9], %14 {strides = array<i32>} : memref<4x128x8xf32, #tpu.memory_space<vmem>>, vector<1x128x8xf32>,
    %15 = vector.extract_strided_slice %2 {offsets = [0, 24], sizes = [128, 8], strides = [1, 1]} : vector<128x32xf32> to vector<128x8xf32>
    %c3 = arith.constant 3 : index
    %c0_10 = arith.constant 0 : index
    %c0_11 = arith.constant 0 : index
    %16 = vector.load %arg5[%c3, %c0_10, %c0_11] : memref<4x128x8xf32, #tpu.memory_space<vmem>>, vector<1x128x8xf32>
    %17 = vector.shape_cast %16 : vector<1x128x8xf32> to vector<128x8xf32>
    %18 = vector.shape_cast %15 : vector<128x8xf32> to vector<1x128x8xf32>
    tpu.vector_store %arg5[%c3, %c0_10, %c0_11], %18 {strides = array<i32>} : memref<4x128x8xf32, #tpu.memory_space<vmem>>, vector<1x128x8xf32>,
    %c0_12 = arith.constant 0 : index
    %c0_13 = arith.constant 0 : index
    %19 = vector.load %arg3[%c0_12, %c0_13] : memref<4x16xf32, #tpu.memory_space<vmem>>, vector<4x16xf32>
    %cst_14 = arith.constant dense<0.000000e+00> : vector<4x128xf32>
    %20 = tpu.matmul %19, %0, %cst_14 {dimension_numbers = #tpu.dot_dimension_numbers<[1], [1], [0], [0], [0, 0, 1, 0], [], []>} : vector<4x16xf32>, vector<128x16xf32>, vector<4x128xf32> -> vector<4x128xf32>
    %c0_15 = arith.constant 0 : index
    %c0_16 = arith.constant 0 : index
    %21 = vector.load %arg6[%c0_15, %c0_16] : memref<4x128xf32, #tpu.memory_space<vmem>>, vector<4x128xf32>
    tpu.vector_store %arg6[%c0_15, %c0_16], %20 {strides = array<i32>} : memref<4x128xf32, #tpu.memory_space<vmem>>, vector<4x128xf32>,
    %c0_17 = arith.constant 0 : index
    %c0_18 = arith.constant 0 : index
    %22 = vector.load %arg4[%c0_17, %c0_18] : memref<16x4xf32, #tpu.memory_space<vmem>>, vector<16x4xf32>
    %cst_19 = arith.constant dense<0.000000e+00> : vector<128x4xf32>
    %23 = tpu.matmul %0, %22, %cst_19 {dimension_numbers = #tpu.dot_dimension_numbers<[1], [0], [0], [1], [0, 0, 1, 1], [], []>} : vector<128x16xf32>, vector<16x4xf32>, vector<128x4xf32> -> vector<128x4xf32>
    %c0_20 = arith.constant 0 : index
    %c0_21 = arith.constant 0 : index
    %24 = vector.load %arg7[%c0_20, %c0_21] : memref<128x4xf32, #tpu.memory_space<vmem>>, vector<128x4xf32>
    tpu.vector_store %arg7[%c0_20, %c0_21], %23 {strides = array<i32>} : memref<128x4xf32, #tpu.memory_space<vmem>>, vector<128x4xf32>,
    return
  }
  func.func @transform_0(%arg0: i32) -> (i32, i32) {
    %c0_i32 = arith.constant 0 : i32
    %c0_i32_0 = arith.constant 0 : i32
    return %arg0, %c0_i32 : i32, i32
  }
  func.func @transform_1(%arg0: i32) -> (i32, i32) {
    %c0_i32 = arith.constant 0 : i32
    %c0_i32_0 = arith.constant 0 : i32
    %c0_i32_1 = arith.constant 0 : i32
    return %c0_i32, %c0_i32_0 : i32, i32
  }
  func.func @transform_2(%arg0: i32) -> (i32, i32) {
    %c0_i32 = arith.constant 0 : i32
    %c0_i32_0 = arith.constant 0 : i32
    %c0_i32_1 = arith.constant 0 : i32
    return %c0_i32, %c0_i32_0 : i32, i32
  }
  func.func @transform_3(%arg0: i32) -> (i32, i32) {
    %c0_i32 = arith.constant 0 : i32
    %c0_i32_0 = arith.constant 0 : i32
    %c0_i32_1 = arith.constant 0 : i32
    return %c0_i32, %c0_i32_0 : i32, i32
  }
  func.func @transform_4(%arg0: i32) -> (i32, i32, i32) {
    %c0_i32 = arith.constant 0 : i32
    %c0_i32_0 = arith.constant 0 : i32
    %c0_i32_1 = arith.constant 0 : i32
    return %c0_i32, %arg0, %c0_i32_0 : i32, i32, i32
  }
  func.func @transform_5(%arg0: i32) -> (i32, i32) {
    %c0_i32 = arith.constant 0 : i32
    %c0_i32_0 = arith.constant 0 : i32
    return %c0_i32, %arg0 : i32, i32
  }
  func.func @transform_6(%arg0: i32) -> (i32, i32) {
    %c0_i32 = arith.constant 0 : i32
    %c0_i32_0 = arith.constant 0 : i32
    return %arg0, %c0_i32 : i32, i32
  }
}

</mosaic_0001>

<bundles_post_ra>
// kernel: tpu_custom_call.1
= control target key start
LH: loop header
LB: loop body
LE: loop exit
PB: predicated region body
PF: predicated region fallthrough
CT: control target
= control target key end

     0   :  { %12 = vsyncpa [#allocation4], 0  ;;  %s2391_s0 = inlined_call_operand.vmem [shape: f32[256,16], index: 0, kind: input, shape index: {}]   ;;  %s2392_s1 = inlined_call_operand.vmem [shape: f32[16,32], index: 1, kind: input, shape index: {}]   ;;  %s2393_s2 = inlined_call_operand.vmem [shape: f32[4,16], index: 2, kind: input, shape index: {}]   ;;  %s2394_s3 = inlined_call_operand.vmem [shape: f32[16,4], index: 3, kind: input, shape index: {}]   ;;  %s2395_s4 = inlined_call_operand.vmem [shape: f32[4,256,8], index: 4, kind: output, shape index: {0}]   ;;  %s2396_s5 = inlined_call_operand.hbm [shape: f32[4,256], index: 5, kind: output, shape index: {1}]   ;;  %s2397_s6 = inlined_call_operand.vmem [shape: f32[256,4], index: 6, kind: output, shape index: {2}]  }
   0x1   :  { %14 = vsyncpa [#allocation4 + $0x1], 0  ;;  %s1788_s21 = smov 0   ;;  %s1790_s22 = smov 0  }
   0x2   :  { %s1792_s23 = smov 0   ;;  %s1794_s24 = smov 0  }
   0x3 LB: > { %s1809_s25 = sadd.s32 4294967295, %s1745_s24   ;;  %s1382_s26 = sadd.s32 4294967294, %s1745_s24   ;;  %s1745_s24 = sphi %s1794_s24, %s2403_s24   ;;  %s1741_s23 = sphi %s1792_s23, %s2402_s23   ;;  %s1737_s22 = sphi %s1790_s22, %s2401_s22   ;;  %s1733_s21 = sphi %s1788_s21, %s2400_s21  }
   0x4   : > { %s1813_s27 = sadd.s32 1, %s1745_s24   ;;  %s116_s28 = sadd.s32 1, %s1741_s23 }
   0x5   : > { %s113_s29 = ssub.s32 %s1745_s24, %s1813_s27  ;;  %p126_p0 = scmp.ne.s32.totalorder %s1741_s23, %s1737_s22 }
   0x6   : > { %p114_p1 = scmp.eq.s32.totalorder %s113_s29, 0  ;;  %p127_p2 = scmp.eq.s32.totalorder %s1809_s25, 1 }
   0x7   : > { %p158_p3 = scmp.ne.s32.totalorder %s1737_s22, %s1733_s21  ;;  %p159_p4 = scmp.eq.s32.totalorder %s1382_s26, 1 }
   0x8   : > { %s1824_s30 = scalar_select %p114_p1, %s1741_s23, %s116_s28  }
   0x9   : > { %p1826_p5 = por %p127_p2, %p126_p0  ;;  %p1830_p6 = por %p159_p4, %p158_p3 }
   0xa   : > { %p1385_p7 = scmp.ge.s32.totalorder %s1745_s24, 1  ;;  %p221_p8 = scmp.lt.s32.totalorder %s1745_s24, 3 }
   0xc   : > { %p222_p9 = pnand %p1385_p7, %p221_p8 }
   0xd   : > { %s1388_s13 = sshll.u32 (!%p222_p9), %s1809_s25, 4  ;;  %s1970_s9 = sand.u32 (!%p222_p9), 1, %s1737_s22  }
   0xe   : > { %225 = sbr.rel (%p222_p9) target bundleno = 456 (0x1c8), region = 36  ;;  %p261_p10 = scmp.lt.s32.totalorder (!%p222_p9), %s1388_s13, 31 }
   0xf   : > { %s1386_s10 = sshll.u32 (!%p222_p9), %s1970_s9, 9  ;;  %s1749_s12 = smov (!%p222_p9), 112  }
  0x10   : > { %s1973_s11 = scalar_lea.vmem (!%p222_p9), [#allocation2], %s1386_s10  ;;  %s1750_s14 = smov (!%p222_p9), 120  }
  0x11   : > { %s1751_s15 = smov (!%p222_p9), 104   ;;  %s957_s20 = scalar_lea.sflag (!%p222_p9), [#allocation4], %s1970_s9 }
  0x13   : > { %v290_v0 = vld [vmem:[%s2392_s1 + $0x8] sm:$0xff]  ;;  %v289_v1 = vld [vmem:[%s2392_s1] sm:$0xff]  ;;  %v1747_v2 = vmov 0.0   ;;  %s2405_s13 = smov (!%p261_p10, %s1388_s13), 31  ;;  %vm291_vm0 = vcmask 130048   ;;  %vm1748_vm1 = vmmov 0  }
  0x14   : > { %1550 = vmatprep.subr.mxu0 %v290_v0  ;;  %1578 = vmatprep.subr.mxu1 %v1747_v2  ;;  %v789_v3 = vld [vmem:[%s2394_s3 + $0x8] sm:$0xff]  ;;  %s1389_s16 = sshll.u32 %s2405_s13, 3  ;;  %v788_v7 = vld [vmem:[%s2394_s3] sm:$0xff]  ;;  %vm485_vm2 = vcmask 64512   ;;  %vm935_vm3 = vcmask 31744   ;;  %s1387_s13 = sshll.u32 %s1970_s9, 2 }
  0x15   : > { %1551 = vmatpush3.msra.mxu0 %v290_v0  ;;  %s1855_s19 = scalar_lea.vmem %s2391_s0, %s1389_s16  ;;  %v713_v21 = vld [vmem:[%s2393_s2] sm:$0xf]  ;;  %1610 = vmatprep.mubr.msk.f32.mxu1 %vm1748_vm1, %v1747_v2  ;;  %s1496_s26 = sshll.u32 (%p1826_p5), %s1809_s25, 7 }
  0x16   : > { %1552 = vmatprep.subr.mxu0 %v289_v1  ;;  %v1858_v4 = vld [vmem:[%s1855_s19] sm:$0xff]  ;;  %v1861_v5 = vld [vmem:[%s1855_s19 + $0x8] sm:$0xff]  ;;  %v1864_v6 = vld [vmem:[%s1855_s19 + $0x10] sm:$0xff]  ;;  %s2228_s10 = scalar_lea.vmem (%p1826_p5), %s2395_s4, %s1496_s26 }
  0x17   : > { %1553 = vmatpush3.msra.mxu0 %v289_v1  ;;  %1554 = vmatprep.mubr.msk.f32.mxu0 %vm291_vm0, %v1858_v4  ;;  %v1876_v8 = vld [vmem:[%s1855_s19 + $0x18] sm:$0xff]  ;;  %v277_v9 = vld [vmem:[%s1855_s19 + $0x20] sm:$0xff]  ;;  %v278_v11 = vld [vmem:[%s1855_s19 + $0x28] sm:$0xff] }
  0x18   : > { %1613 = vmatprep.subr.mxu0 %v789_v3  ;;  %1555 = vmatmul.mubr.msk.f32.vlgmr.msra.gmra.mxu0 %vm291_vm0, %v1861_v5  ;;  %v1880_v10 = vld [vmem:[%s1855_s19 + $0x78] sm:$0xff]  ;;  %v279_v12 = vld [vmem:[%s1855_s19 + $0x30] sm:$0xff]  ;;  %v281_v15 = vld [vmem:[%s1855_s19 + $0x40] sm:$0xff] }
  0x19   : > { %1557 = vmatprep.mubr.msk.f32.mxu0 %vm291_vm0, %v1864_v6  ;;  %1614 = vmatpush3.msra.mxu0 %v789_v3  ;;  %v287_v13 = vld [vmem:[%s1855_s19 + $0x70] sm:$0xff]  ;;  %v280_v14 = vld [vmem:[%s1855_s19 + $0x38] sm:$0xff]  ;;  %v286_v16 = vld [vmem:[%s1855_s19 + $0x68] sm:$0xff] }
  0x1a   : > { %1615 = vmatprep.subr.mxu0 %v788_v7  ;;  %1579 = vmatpush3.xpose.msk.msra.mxu1 %vm291_vm0, %v1880_v10  ;;  %v282_v17 = vld [vmem:[%s1855_s19 + $0x48] sm:$0xff]  ;;  %v283_v18 = vld [vmem:[%s1855_s19 + $0x50] sm:$0xff]  ;;  %v285_v19 = vld [vmem:[%s1855_s19 + $0x60] sm:$0xff] }
  0x1b   : > { %1616 = vmatpush3.msra.mxu0 %v788_v7  ;;  %1580 = vmatprep.subr.mxu1 %v1747_v2  ;;  %v284_v20 = vld [vmem:[%s1855_s19 + $0x58] sm:$0xff]  ;;  %s2048_s19 = scalar_lea.vmem %s2397_s6, %s1389_s16  ;;  %s2101_s16 = scalar_lea.vmem [#allocation3], %s1387_s13 }
  0x1c   : > { %1558 = vmatmul.mubr.msk.f32.gmra.mxu0 %vm291_vm0, %v1876_v8 }
  0x1d   : > { %1560 = vmatprep.mubr.msk.f32.mxu0 %vm291_vm0, %v277_v9 }
  0x1e   : > { %1581 = vmatpush3.xpose.msk.msra.mxu1 %vm291_vm0, %v287_v13 }
  0x1f   : > { %1582 = vmatprep.subr.mxu1 %v1747_v2 }
  0x20   : > { %1561 = vmatmul.mubr.msk.f32.gmra.mxu0 %vm291_vm0, %v278_v11 }
  0x21   : > { %1563 = vmatprep.mubr.msk.f32.mxu0 %vm291_vm0, %v279_v12 }
  0x22   : > { %1583 = vmatpush3.xpose.msk.msra.mxu1 %vm291_vm0, %v286_v16 }
  0x23   : > { %1584 = vmatprep.subr.mxu1 %v1747_v2 }
  0x24   : > { %1564 = vmatmul.mubr.msk.f32.gmra.mxu0 %vm291_vm0, %v280_v14 }
  0x25   : > { %1566 = vmatprep.mubr.msk.f32.mxu0 %vm291_vm0, %v281_v15 }
  0x26   : > { %1585 = vmatpush3.xpose.msk.msra.mxu1 %vm291_vm0, %v285_v19 }
  0x27   : > { %1586 = vmatprep.subr.mxu1 %v1747_v2 }
  0x28   : > { %1567 = vmatmul.mubr.msk.f32.gmra.mxu0 %vm291_vm0, %v282_v17 }
  0x29   : > { %1569 = vmatprep.mubr.msk.f32.mxu0 %vm291_vm0, %v283_v18 }
  0x2a   : > { %1587 = vmatpush3.xpose.msk.msra.mxu1 %vm291_vm0, %v284_v20 }
  0x2b   : > { %1588 = vmatprep.subr.mxu1 %v1747_v2 }
  0x2c   : > { %1570 = vmatmul.mubr.msk.f32.gmra.mxu0 %vm291_vm0, %v284_v20 }
  0x2d   : > { %1572 = vmatprep.mubr.msk.f32.mxu0 %vm291_vm0, %v285_v19 }
  0x2e   : > { %1589 = vmatpush3.xpose.msk.msra.mxu1 %vm291_vm0, %v283_v18 }
  0x2f   : > { %1590 = vmatprep.subr.mxu1 %v1747_v2 }
  0x30   : > { %1573 = vmatmul.mubr.msk.f32.gmra.mxu0 %vm291_vm0, %v286_v16 }
  0x31   : > { %1575 = vmatprep.mubr.msk.f32.mxu0 %vm291_vm0, %v287_v13 }
  0x32   : > { %1591 = vmatpush3.xpose.msk.msra.mxu1 %vm291_vm0, %v282_v17 }
  0x33   : > { %1592 = vmatprep.subr.mxu1 %v1747_v2 }
  0x34   : > { %1576 = vmatmul.mubr.msk.f32.gmra.mxu0 %vm291_vm0, %v1880_v10 }
  0x35   : > { %1617 = vmatprep.mubr.msk.f32.mxu0 %vm291_vm0, %v1858_v4 }
  0x36   : > { %1593 = vmatpush3.xpose.msk.msra.mxu1 %vm291_vm0, %v281_v15 }
  0x37   : > { %1594 = vmatprep.subr.mxu1 %v1747_v2 }
  0x38   : > { %1618 = vmatmul.mubr.msk.f32.vlgmr.msra.gmra.mxu0 %vm291_vm0, %v1861_v5 }
  0x39   : > { %1620 = vmatprep.mubr.msk.f32.mxu0 %vm291_vm0, %v1864_v6 }
  0x3a   : > { %1595 = vmatpush3.xpose.msk.msra.mxu1 %vm291_vm0, %v280_v14 }
  0x3b   : > { %1596 = vmatprep.subr.mxu1 %v1747_v2 }
  0x3c   : > { %1621 = vmatmul.mubr.msk.f32.gmra.mxu0 %vm291_vm0, %v1876_v8 }
  0x3d   : > { %1623 = vmatprep.mubr.msk.f32.mxu0 %vm291_vm0, %v277_v9 }
  0x3e   : > { %1597 = vmatpush3.xpose.msk.msra.mxu1 %vm291_vm0, %v279_v12 }
  0x3f   : > { %1598 = vmatprep.subr.mxu1 %v1747_v2 }
  0x40   : > { %1624 = vmatmul.mubr.msk.f32.gmra.mxu0 %vm291_vm0, %v278_v11 }
  0x41   : > { %1626 = vmatprep.mubr.msk.f32.mxu0 %vm291_vm0, %v279_v12 }
  0x42   : > { %1599 = vmatpush3.xpose.msk.msra.mxu1 %vm291_vm0, %v278_v11 }
  0x43   : > { %1600 = vmatprep.subr.mxu1 %v1747_v2 }
  0x44   : > { %1627 = vmatmul.mubr.msk.f32.gmra.mxu0 %vm291_vm0, %v280_v14 }
  0x45   : > { %1629 = vmatprep.mubr.msk.f32.mxu0 %vm291_vm0, %v281_v15 }
  0x46   : > { %1601 = vmatpush3.xpose.msk.msra.mxu1 %vm291_vm0, %v277_v9 }
  0x47   : > { %1602 = vmatprep.subr.mxu1 %v1747_v2 }
  0x48   : > { %1630 = vmatmul.mubr.msk.f32.gmra.mxu0 %vm291_vm0, %v282_v17 }
  0x49   : > { %1632 = vmatprep.mubr.msk.f32.mxu0 %vm291_vm0, %v283_v18 }
  0x4a   : > { %1603 = vmatpush3.xpose.msk.msra.mxu1 %vm291_vm0, %v1876_v8 }
  0x4b   : > { %1604 = vmatprep.subr.mxu1 %v1747_v2 }
  0x4c   : > { %1633 = vmatmul.mubr.msk.f32.gmra.mxu0 %vm291_vm0, %v284_v20 }
  0x4d   : > { %1635 = vmatprep.mubr.msk.f32.mxu0 %vm291_vm0, %v285_v19 }
  0x4e   : > { %1605 = vmatpush3.xpose.msk.msra.mxu1 %vm291_vm0, %v1864_v6 }
  0x4f   : > { %1606 = vmatprep.subr.mxu1 %v1747_v2 }
  0x50   : > { %1636 = vmatmul.mubr.msk.f32.gmra.mxu0 %vm291_vm0, %v286_v16 }
  0x51   : > { %1638 = vmatprep.mubr.msk.f32.mxu0 %vm291_vm0, %v287_v13 }
  0x52   : > { %1607 = vmatpush3.xpose.msk.msra.mxu1 %vm291_vm0, %v1861_v5 }
  0x53   : > { %1608 = vmatprep.subr.mxu1 %v1747_v2 }
  0x54   : > { %1639 = vmatmul.mubr.msk.f32.gmra.mxu0 %vm291_vm0, %v1880_v10 }
  0x56   : > { %1609 = vmatpush3.xpose.msk.msra.mxu1 %vm291_vm0, %v1858_v4 }
  0x59   : > { %1611 = vmatmul.mubr.msk.f32.vlgmr.msra.gmra.mxu1 %vm291_vm0, %v713_v21 }
  0xd8   : > { %v1556_v22 = vpop.f32.mrf.mxu0 }
  0xd9   : > { %487 = vst.msk [vmem:[%s1973_s11 + $0x8] sm:$0xff] %vm485_vm2, %v1556_v22  ;;  %585 = vrot.lane.b32.xlu1 %v1556_v22, %s1749_s12  ;;  %520 = vrot.lane.b32.xlu0 %v1556_v22, %s1750_s14 }
  0xda   : > { %v406_v23 = vpop.f32.mrf.mxu0 }
  0xdb   : > { %486 = vst.msk [vmem:[%s1973_s11] sm:$0xff] %vm485_vm2, %v406_v23 }
  0xdc   : > { %v1559_v24 = vpop.f32.mrf.mxu0 }
  0xdd   : > { %650 = vrot.lane.b32.xlu1 %v1556_v22, %s1751_s15  ;;  %518 = vrot.lane.b32.xlu0 %v406_v23, %s1750_s14  ;;  %489 = vst.msk [vmem:[%s1973_s11 + $0x18] sm:$0xff] %vm485_vm2, %v1559_v24 }
  0xde   : > { %v416_v25 = vpop.f32.mrf.mxu0 }
  0xdf   : > { %488 = vst.msk [vmem:[%s1973_s11 + $0x10] sm:$0xff] %vm485_vm2, %v416_v25 }
  0xe0   : > { %v1562_v26 = vpop.f32.mrf.mxu0 }
  0xe1   : > { %583 = vrot.lane.b32.xlu0 %v406_v23, %s1749_s12  ;;  %524 = vrot.lane.b32.xlu1 %v1559_v24, %s1750_s14  ;;  %491 = vst.msk [vmem:[%s1973_s11 + $0x28] sm:$0xff] %vm485_vm2, %v1562_v26 }
  0xe2   : > { %v426_v27 = vpop.f32.mrf.mxu0 }
  0xe3   : > { %490 = vst.msk [vmem:[%s1973_s11 + $0x20] sm:$0xff] %vm485_vm2, %v426_v27 }
  0xe4   : > { %v1565_v28 = vpop.f32.mrf.mxu0 }
  0xe5   : > { %648 = vrot.lane.b32.xlu0 %v406_v23, %s1751_s15  ;;  %589 = vrot.lane.b32.xlu1 %v1559_v24, %s1749_s12  ;;  %493 = vst.msk [vmem:[%s1973_s11 + $0x38] sm:$0xff] %vm485_vm2, %v1565_v28 }
  0xe6   : > { %v436_v29 = vpop.f32.mrf.mxu0 }
  0xe7   : > { %492 = vst.msk [vmem:[%s1973_s11 + $0x30] sm:$0xff] %vm485_vm2, %v436_v29 }
  0xe8   : > { %v1568_v30 = vpop.f32.mrf.mxu0 }
  0xe9   : > { %654 = vrot.lane.b32.xlu1 %v1559_v24, %s1751_s15  ;;  %587 = vrot.lane.b32.xlu0 %v416_v25, %s1749_s12  ;;  %495 = vst.msk [vmem:[%s1973_s11 + $0x48] sm:$0xff] %vm485_vm2, %v1568_v30 }
  0xea   : > { %v446_v31 = vpop.f32.mrf.mxu0 }
  0xeb   : > { %494 = vst.msk [vmem:[%s1973_s11 + $0x40] sm:$0xff] %vm485_vm2, %v446_v31 }
  0xec   : > { %v1571_v32 = vpop.f32.mrf.mxu0 }
  0xed   : > { %652 = vrot.lane.b32.xlu0 %v416_v25, %s1751_s15  ;;  %522 = vrot.lane.b32.xlu1 %v416_v25, %s1750_s14  ;;  %497 = vst.msk [vmem:[%s1973_s11 + $0x58] sm:$0xff] %vm485_vm2, %v1571_v32 }
  0xee   : > { %v456_v33 = vpop.f32.mrf.mxu0 }
  0xef   : > { %496 = vst.msk [vmem:[%s1973_s11 + $0x50] sm:$0xff] %vm485_vm2, %v456_v33 }
  0xf0   : > { %v2011_v34 = vpop.f32.mrf.mxu0 }
  0xf1   : > { %528 = vrot.lane.b32.xlu1 %v1562_v26, %s1750_s14  ;;  %526 = vrot.lane.b32.xlu0 %v426_v27, %s1750_s14  ;;  %499 = vst.msk [vmem:[%s1973_s11 + $0x68] sm:$0xff] %vm485_vm2, %v2011_v34 }
  0xf2   : > { %v2018_v35 = vpop.f32.mrf.mxu0 }
  0xf3   : > { %498 = vst.msk [vmem:[%s1973_s11 + $0x60] sm:$0xff] %vm485_vm2, %v2018_v35 }
  0xf4   : > { %v2023_v36 = vpop.f32.mrf.mxu0 }
  0xf5   : > { %593 = vrot.lane.b32.xlu1 %v1562_v26, %s1749_s12  ;;  %591 = vrot.lane.b32.xlu0 %v426_v27, %s1749_s12  ;;  %501 = vst.msk [vmem:[%s1973_s11 + $0x78] sm:$0xff] %vm485_vm2, %v2023_v36 }
  0xf6   : > { %v2030_v37 = vpop.f32.mrf.mxu0 }
  0xf7   : > { %500 = vst.msk [vmem:[%s1973_s11 + $0x70] sm:$0xff] %vm485_vm2, %v2030_v37 }
  0xf8   : > { %v1619_v38 = vpop.f32.mrf.mxu0 }
  0xf9   : > { %658 = vrot.lane.b32.xlu1 %v1562_v26, %s1751_s15  ;;  %656 = vrot.lane.b32.xlu0 %v426_v27, %s1751_s15  ;;  %937 = vst.msk [vmem:[%s2048_s19 + $0x8] sm:$0xff] %vm935_vm3, %v1619_v38 }
  0xfa   : > { %v856_v39 = vpop.f32.mrf.mxu0 }
  0xfb   : > { %936 = vst.msk [vmem:[%s2048_s19] sm:$0xff] %vm935_vm3, %v856_v39 }
  0xfc   : > { %v1622_v40 = vpop.f32.mrf.mxu0 }
  0xfd   : > { %532 = vrot.lane.b32.xlu1 %v1565_v28, %s1750_s14  ;;  %530 = vrot.lane.b32.xlu0 %v436_v29, %s1750_s14  ;;  %939 = vst.msk [vmem:[%s2048_s19 + $0x18] sm:$0xff] %vm935_vm3, %v1622_v40  ;;  %v1126_v40 = vld [vmem:[%s1973_s11] sm:$0xff] (%p1826_p5) }
  0xfe   : > { %v866_v41 = vpop.f32.mrf.mxu0  ;;  %1127 = vst [vmem:[%s2228_s10] sm:$0xff] (%p1826_p5), %v1126_v40 }
  0xff   : > { %938 = vst.msk [vmem:[%s2048_s19 + $0x10] sm:$0xff] %vm935_vm3, %v866_v41  ;;  %v1128_v41 = vld [vmem:[%s1973_s11 + $0x8] sm:$0xff] (%p1826_p5) }
 0x100   : > { %v1625_v42 = vpop.f32.mrf.mxu0  ;;  %1129 = vst [vmem:[%s2228_s10 + $0x8] sm:$0xff] (%p1826_p5), %v1128_v41 }
 0x101   : > { %597 = vrot.lane.b32.xlu1 %v1565_v28, %s1749_s12  ;;  %595 = vrot.lane.b32.xlu0 %v436_v29, %s1749_s12  ;;  %941 = vst.msk [vmem:[%s2048_s19 + $0x28] sm:$0xff] %vm935_vm3, %v1625_v42  ;;  %v1130_v42 = vld [vmem:[%s1973_s11 + $0x10] sm:$0xff] (%p1826_p5) }
 0x102   : > { %v876_v43 = vpop.f32.mrf.mxu0  ;;  %1131 = vst [vmem:[%s2228_s10 + $0x10] sm:$0xff] (%p1826_p5), %v1130_v42 }
 0x103   : > { %940 = vst.msk [vmem:[%s2048_s19 + $0x20] sm:$0xff] %vm935_vm3, %v876_v43  ;;  %v1132_v43 = vld [vmem:[%s1973_s11 + $0x18] sm:$0xff] (%p1826_p5) }
 0x104   : > { %v1628_v44 = vpop.f32.mrf.mxu0  ;;  %1133 = vst [vmem:[%s2228_s10 + $0x18] sm:$0xff] (%p1826_p5), %v1132_v43 }
 0x105   : > { %662 = vrot.lane.b32.xlu1 %v1565_v28, %s1751_s15  ;;  %660 = vrot.lane.b32.xlu0 %v436_v29, %s1751_s15  ;;  %943 = vst.msk [vmem:[%s2048_s19 + $0x38] sm:$0xff] %vm935_vm3, %v1628_v44  ;;  %v1134_v44 = vld [vmem:[%s1973_s11 + $0x20] sm:$0xff] (%p1826_p5) }
 0x106   : > { %v886_v45 = vpop.f32.mrf.mxu0  ;;  %1135 = vst [vmem:[%s2228_s10 + $0x20] sm:$0xff] (%p1826_p5), %v1134_v44 }
 0x107   : > { %942 = vst.msk [vmem:[%s2048_s19 + $0x30] sm:$0xff] %vm935_vm3, %v886_v45  ;;  %v1136_v45 = vld [vmem:[%s1973_s11 + $0x28] sm:$0xff] (%p1826_p5) }
 0x108   : > { %v1631_v46 = vpop.f32.mrf.mxu0  ;;  %1137 = vst [vmem:[%s2228_s10 + $0x28] sm:$0xff] (%p1826_p5), %v1136_v45 }
 0x109   : > { %536 = vrot.lane.b32.xlu1 %v1568_v30, %s1750_s14  ;;  %534 = vrot.lane.b32.xlu0 %v446_v31, %s1750_s14  ;;  %945 = vst.msk [vmem:[%s2048_s19 + $0x48] sm:$0xff] %vm935_vm3, %v1631_v46  ;;  %v1138_v46 = vld [vmem:[%s1973_s11 + $0x30] sm:$0xff] (%p1826_p5) }
 0x10a   : > { %v896_v47 = vpop.f32.mrf.mxu0  ;;  %1139 = vst [vmem:[%s2228_s10 + $0x30] sm:$0xff] (%p1826_p5), %v1138_v46 }
 0x10b   : > { %944 = vst.msk [vmem:[%s2048_s19 + $0x40] sm:$0xff] %vm935_vm3, %v896_v47  ;;  %v1140_v47 = vld [vmem:[%s1973_s11 + $0x38] sm:$0xff] (%p1826_p5) }
 0x10c   : > { %v1634_v48 = vpop.f32.mrf.mxu0  ;;  %1141 = vst [vmem:[%s2228_s10 + $0x38] sm:$0xff] (%p1826_p5), %v1140_v47 }
 0x10d   : > { %601 = vrot.lane.b32.xlu1 %v1568_v30, %s1749_s12  ;;  %599 = vrot.lane.b32.xlu0 %v446_v31, %s1749_s12  ;;  %947 = vst.msk [vmem:[%s2048_s19 + $0x58] sm:$0xff] %vm935_vm3, %v1634_v48  ;;  %v1142_v48 = vld [vmem:[%s1973_s11 + $0x40] sm:$0xff] (%p1826_p5) }
 0x10e   : > { %v906_v49 = vpop.f32.mrf.mxu0  ;;  %1143 = vst [vmem:[%s2228_s10 + $0x40] sm:$0xff] (%p1826_p5), %v1142_v48 }
 0x10f   : > { %946 = vst.msk [vmem:[%s2048_s19 + $0x50] sm:$0xff] %vm935_vm3, %v906_v49  ;;  %v1144_v49 = vld [vmem:[%s1973_s11 + $0x48] sm:$0xff] (%p1826_p5) }
 0x110   : > { %v1637_v50 = vpop.f32.mrf.mxu0  ;;  %1145 = vst [vmem:[%s2228_s10 + $0x48] sm:$0xff] (%p1826_p5), %v1144_v49 }
 0x111   : > { %666 = vrot.lane.b32.xlu1 %v1568_v30, %s1751_s15  ;;  %664 = vrot.lane.b32.xlu0 %v446_v31, %s1751_s15  ;;  %949 = vst.msk [vmem:[%s2048_s19 + $0x68] sm:$0xff] %vm935_vm3, %v1637_v50  ;;  %v1146_v50 = vld [vmem:[%s1973_s11 + $0x50] sm:$0xff] (%p1826_p5) }
 0x112   : > { %v916_v51 = vpop.f32.mrf.mxu0  ;;  %1147 = vst [vmem:[%s2228_s10 + $0x50] sm:$0xff] (%p1826_p5), %v1146_v50 }
 0x113   : > { %948 = vst.msk [vmem:[%s2048_s19 + $0x60] sm:$0xff] %vm935_vm3, %v916_v51  ;;  %v1148_v51 = vld [vmem:[%s1973_s11 + $0x58] sm:$0xff] (%p1826_p5) }
 0x114   : > { %v1640_v52 = vpop.f32.mrf.mxu0  ;;  %1149 = vst [vmem:[%s2228_s10 + $0x58] sm:$0xff] (%p1826_p5), %v1148_v51 }
 0x115   : > { %540 = vrot.lane.b32.xlu1 %v1571_v32, %s1750_s14  ;;  %538 = vrot.lane.b32.xlu0 %v456_v33, %s1750_s14  ;;  %951 = vst.msk [vmem:[%s2048_s19 + $0x78] sm:$0xff] %vm935_vm3, %v1640_v52  ;;  %v1150_v52 = vld [vmem:[%s1973_s11 + $0x60] sm:$0xff] (%p1826_p5) }
 0x116   : > { %v926_v54 = vpop.f32.mrf.mxu0  ;;  %1151 = vst [vmem:[%s2228_s10 + $0x60] sm:$0xff] (%p1826_p5), %v1150_v52 }
 0x117   : > { %950 = vst.msk [vmem:[%s2048_s19 + $0x70] sm:$0xff] %vm935_vm3, %v926_v54  ;;  %v1154_v54 = vld [vmem:[%s1973_s11 + $0x70] sm:$0xff] (%p1826_p5) }
 0x118   : > { %1155 = vst [vmem:[%s2228_s10 + $0x70] sm:$0xff] (%p1826_p5), %v1154_v54 }
 0x119   : > { %605 = vrot.lane.b32.xlu1 %v1571_v32, %s1749_s12  ;;  %603 = vrot.lane.b32.xlu0 %v456_v33, %s1749_s12  ;;  %v783_v53 = vpop.f32.mrf.mxu1 }
 0x11a   : > { %787 = vst [vmem:[%s2101_s16] sm:$0xf] %v783_v53  ;;  %v1152_v53 = vld [vmem:[%s1973_s11 + $0x68] sm:$0xff] (%p1826_p5) }
 0x11b   : > { %v1612_v55 = vpop.f32.mrf.mxu1  ;;  %1153 = vst [vmem:[%s2228_s10 + $0x68] sm:$0xff] (%p1826_p5), %v1152_v53 }
 0x11c   : > { %v1156_v55 = vld [vmem:[%s1973_s11 + $0x78] sm:$0xff] (%p1826_p5) }
 0x11d   : > { %670 = vrot.lane.b32.xlu1 %v1571_v32, %s1751_s15  ;;  %668 = vrot.lane.b32.xlu0 %v456_v33, %s1751_s15  ;;  %1157 = vst [vmem:[%s2228_s10 + $0x78] sm:$0xff] (%p1826_p5), %v1156_v55 }
 0x121   : > { %544 = vrot.lane.b32.xlu1 %v2011_v34, %s1750_s14  ;;  %542 = vrot.lane.b32.xlu0 %v2018_v35, %s1750_s14 }
 0x125   : > { %609 = vrot.lane.b32.xlu1 %v2011_v34, %s1749_s12  ;;  %607 = vrot.lane.b32.xlu0 %v2018_v35, %s1749_s12 }
 0x129   : > { %674 = vrot.lane.b32.xlu1 %v2011_v34, %s1751_s15  ;;  %672 = vrot.lane.b32.xlu0 %v2018_v35, %s1751_s15 }
 0x12d   : > { %548 = vrot.lane.b32.xlu1 %v2023_v36, %s1750_s14  ;;  %546 = vrot.lane.b32.xlu0 %v2030_v37, %s1750_s14 }
 0x131   : > { %613 = vrot.lane.b32.xlu1 %v2023_v36, %s1749_s12  ;;  %611 = vrot.lane.b32.xlu0 %v2030_v37, %s1749_s12 }
 0x135   : > { %678 = vrot.lane.b32.xlu1 %v2023_v36, %s1751_s15  ;;  %676 = vrot.lane.b32.xlu0 %v2030_v37, %s1751_s15 }
 0x14b   : > { %v586_v56 = vpop.permute.xlu1 %585  ;;  %v521_v57 = vpop.permute.xlu0 %520 }
 0x14c   : > { %1425 = vst.msk [vmem:[%s1973_s11 + $0x108] sm:$0xff] %vm485_vm2, %v586_v56  ;;  %1409 = vst.msk [vmem:[%s1973_s11 + $0x88] sm:$0xff] %vm485_vm2, %v521_v57 }
 0x14f   : > { %v651_v58 = vpop.permute.xlu1 %650  ;;  %v519_v59 = vpop.permute.xlu0 %518 }
 0x150   : > { %1441 = vst.msk [vmem:[%s1973_s11 + $0x188] sm:$0xff] %vm485_vm2, %v651_v58  ;;  %1408 = vst.msk [vmem:[%s1973_s11 + $0x80] sm:$0xff] %vm485_vm2, %v519_v59 }
 0x153   : > { %v584_v60 = vpop.permute.xlu0 %583  ;;  %v525_v61 = vpop.permute.xlu1 %524  ;;  %v1160_v57 = vld [vmem:[%s1973_s11 + $0x88] sm:$0xff] (%p1826_p5) }
 0x154   : > { %1424 = vst.msk [vmem:[%s1973_s11 + $0x100] sm:$0xff] %vm485_vm2, %v584_v60  ;;  %1411 = vst.msk [vmem:[%s1973_s11 + $0x98] sm:$0xff] %vm485_vm2, %v525_v61 }
 0x155   : > { %1161 = vst [vmem:[%s2228_s10 + $0x108] sm:$0xff] (%p1826_p5), %v1160_v57 }
 0x157   : > { %v649_v62 = vpop.permute.xlu0 %648  ;;  %v590_v63 = vpop.permute.xlu1 %589  ;;  %v1158_v56 = vld [vmem:[%s1973_s11 + $0x80] sm:$0xff] (%p1826_p5) }
 0x158   : > { %1440 = vst.msk [vmem:[%s1973_s11 + $0x180] sm:$0xff] %vm485_vm2, %v649_v62  ;;  %1427 = vst.msk [vmem:[%s1973_s11 + $0x118] sm:$0xff] %vm485_vm2, %v590_v63 }
 0x159   : > { %1159 = vst [vmem:[%s2228_s10 + $0x100] sm:$0xff] (%p1826_p5), %v1158_v56 }
 0x15b   : > { %v655_v0 = vpop.permute.xlu1 %654  ;;  %v588_v1 = vpop.permute.xlu0 %587  ;;  %v1164_v59 = vld [vmem:[%s1973_s11 + $0x98] sm:$0xff] (%p1826_p5) }
 0x15c   : > { %1443 = vst.msk [vmem:[%s1973_s11 + $0x198] sm:$0xff] %vm485_vm2, %v655_v0  ;;  %1426 = vst.msk [vmem:[%s1973_s11 + $0x110] sm:$0xff] %vm485_vm2, %v588_v1 }
 0x15d   : > { %1165 = vst [vmem:[%s2228_s10 + $0x118] sm:$0xff] (%p1826_p5), %v1164_v59 }
 0x15f   : > { %v653_v2 = vpop.permute.xlu0 %652  ;;  %v523_v3 = vpop.permute.xlu1 %522 }
 0x160   : > { %1442 = vst.msk [vmem:[%s1973_s11 + $0x190] sm:$0xff] %vm485_vm2, %v653_v2  ;;  %1410 = vst.msk [vmem:[%s1973_s11 + $0x90] sm:$0xff] %vm485_vm2, %v523_v3 }
 0x163   : > { %v529_v4 = vpop.permute.xlu1 %528  ;;  %v527_v5 = vpop.permute.xlu0 %526 }
 0x164   : > { %1413 = vst.msk [vmem:[%s1973_s11 + $0xa8] sm:$0xff] %vm485_vm2, %v529_v4  ;;  %1412 = vst.msk [vmem:[%s1973_s11 + $0xa0] sm:$0xff] %vm485_vm2, %v527_v5 }
 0x167   : > { %v594_v6 = vpop.permute.xlu1 %593  ;;  %v592_v7 = vpop.permute.xlu0 %591  ;;  %v1162_v58 = vld [vmem:[%s1973_s11 + $0x90] sm:$0xff] (%p1826_p5) }
 0x168   : > { %1429 = vst.msk [vmem:[%s1973_s11 + $0x128] sm:$0xff] %vm485_vm2, %v594_v6  ;;  %1428 = vst.msk [vmem:[%s1973_s11 + $0x120] sm:$0xff] %vm485_vm2, %v592_v7 }
 0x169   : > { %1163 = vst [vmem:[%s2228_s10 + $0x110] sm:$0xff] (%p1826_p5), %v1162_v58 }
 0x16b   : > { %v659_v8 = vpop.permute.xlu1 %658  ;;  %v657_v9 = vpop.permute.xlu0 %656  ;;  %v1166_v60 = vld [vmem:[%s1973_s11 + $0xa0] sm:$0xff] (%p1826_p5)  ;;  %v1168_v61 = vld [vmem:[%s1973_s11 + $0xa8] sm:$0xff] (%p1826_p5) }
 0x16c   : > { %1445 = vst.msk [vmem:[%s1973_s11 + $0x1a8] sm:$0xff] %vm485_vm2, %v659_v8  ;;  %1444 = vst.msk [vmem:[%s1973_s11 + $0x1a0] sm:$0xff] %vm485_vm2, %v657_v9  ;;  %v1190_v8 = vld [vmem:[%s1973_s11 + $0x100] sm:$0xff] (%p1826_p5)  ;;  %v1192_v9 = vld [vmem:[%s1973_s11 + $0x108] sm:$0xff] (%p1826_p5) }
 0x16d   : > { %1167 = vst [vmem:[%s2228_s10 + $0x120] sm:$0xff] (%p1826_p5), %v1166_v60  ;;  %1169 = vst [vmem:[%s2228_s10 + $0x128] sm:$0xff] (%p1826_p5), %v1168_v61 }
 0x16e   : > { %1191 = vst [vmem:[%s2228_s10 + $0x200] sm:$0xff] (%p1826_p5), %v1190_v8  ;;  %1193 = vst [vmem:[%s2228_s10 + $0x208] sm:$0xff] (%p1826_p5), %v1192_v9 }
 0x16f   : > { %v533_v10 = vpop.permute.xlu1 %532  ;;  %v531_v11 = vpop.permute.xlu0 %530 }
 0x170   : > { %1415 = vst.msk [vmem:[%s1973_s11 + $0xb8] sm:$0xff] %vm485_vm2, %v533_v10  ;;  %1414 = vst.msk [vmem:[%s1973_s11 + $0xb0] sm:$0xff] %vm485_vm2, %v531_v11  ;;  %v1194_v10 = vld [vmem:[%s1973_s11 + $0x110] sm:$0xff] (%p1826_p5)  ;;  %v1196_v11 = vld [vmem:[%s1973_s11 + $0x118] sm:$0xff] (%p1826_p5) }
 0x171   : > { %1195 = vst [vmem:[%s2228_s10 + $0x210] sm:$0xff] (%p1826_p5), %v1194_v10  ;;  %1197 = vst [vmem:[%s2228_s10 + $0x218] sm:$0xff] (%p1826_p5), %v1196_v11 }
 0x173   : > { %v598_v12 = vpop.permute.xlu1 %597  ;;  %v596_v13 = vpop.permute.xlu0 %595 }
 0x174   : > { %1431 = vst.msk [vmem:[%s1973_s11 + $0x138] sm:$0xff] %vm485_vm2, %v598_v12  ;;  %1430 = vst.msk [vmem:[%s1973_s11 + $0x130] sm:$0xff] %vm485_vm2, %v596_v13  ;;  %v1198_v12 = vld [vmem:[%s1973_s11 + $0x120] sm:$0xff] (%p1826_p5)  ;;  %v1200_v13 = vld [vmem:[%s1973_s11 + $0x128] sm:$0xff] (%p1826_p5) }
 0x175   : > { %1199 = vst [vmem:[%s2228_s10 + $0x220] sm:$0xff] (%p1826_p5), %v1198_v12  ;;  %1201 = vst [vmem:[%s2228_s10 + $0x228] sm:$0xff] (%p1826_p5), %v1200_v13 }
 0x177   : > { %v663_v14 = vpop.permute.xlu1 %662  ;;  %v661_v15 = vpop.permute.xlu0 %660  ;;  %v1170_v62 = vld [vmem:[%s1973_s11 + $0xb0] sm:$0xff] (%p1826_p5)  ;;  %v1172_v63 = vld [vmem:[%s1973_s11 + $0xb8] sm:$0xff] (%p1826_p5) }
 0x178   : > { %1447 = vst.msk [vmem:[%s1973_s11 + $0x1b8] sm:$0xff] %vm485_vm2, %v663_v14  ;;  %1446 = vst.msk [vmem:[%s1973_s11 + $0x1b0] sm:$0xff] %vm485_vm2, %v661_v15 }
 0x179   : > { %1171 = vst [vmem:[%s2228_s10 + $0x130] sm:$0xff] (%p1826_p5), %v1170_v62  ;;  %1173 = vst [vmem:[%s2228_s10 + $0x138] sm:$0xff] (%p1826_p5), %v1172_v63 }
 0x17b   : > { %v537_v16 = vpop.permute.xlu1 %536  ;;  %v535_v17 = vpop.permute.xlu0 %534  ;;  %v1202_v14 = vld [vmem:[%s1973_s11 + $0x130] sm:$0xff] (%p1826_p5)  ;;  %v1204_v15 = vld [vmem:[%s1973_s11 + $0x138] sm:$0xff] (%p1826_p5) }
 0x17c   : > { %1417 = vst.msk [vmem:[%s1973_s11 + $0xc8] sm:$0xff] %vm485_vm2, %v537_v16  ;;  %1416 = vst.msk [vmem:[%s1973_s11 + $0xc0] sm:$0xff] %vm485_vm2, %v535_v17 }
 0x17d   : > { %1203 = vst [vmem:[%s2228_s10 + $0x230] sm:$0xff] (%p1826_p5), %v1202_v14  ;;  %1205 = vst [vmem:[%s2228_s10 + $0x238] sm:$0xff] (%p1826_p5), %v1204_v15 }
 0x17f   : > { %v602_v18 = vpop.permute.xlu1 %601  ;;  %v600_v19 = vpop.permute.xlu0 %599 }
 0x180   : > { %1433 = vst.msk [vmem:[%s1973_s11 + $0x148] sm:$0xff] %vm485_vm2, %v602_v18  ;;  %1432 = vst.msk [vmem:[%s1973_s11 + $0x140] sm:$0xff] %vm485_vm2, %v600_v19 }
 0x183   : > { %v667_v20 = vpop.permute.xlu1 %666  ;;  %v665_v21 = vpop.permute.xlu0 %664  ;;  %v1174_v0 = vld [vmem:[%s1973_s11 + $0xc0] sm:$0xff] (%p1826_p5)  ;;  %v1176_v1 = vld [vmem:[%s1973_s11 + $0xc8] sm:$0xff] (%p1826_p5) }
 0x184   : > { %1449 = vst.msk [vmem:[%s1973_s11 + $0x1c8] sm:$0xff] %vm485_vm2, %v667_v20  ;;  %1448 = vst.msk [vmem:[%s1973_s11 + $0x1c0] sm:$0xff] %vm485_vm2, %v665_v21 }
 0x185   : > { %1175 = vst [vmem:[%s2228_s10 + $0x140] sm:$0xff] (%p1826_p5), %v1174_v0  ;;  %1177 = vst [vmem:[%s2228_s10 + $0x148] sm:$0xff] (%p1826_p5), %v1176_v1 }
 0x187   : > { %v541_v22 = vpop.permute.xlu1 %540  ;;  %v539_v23 = vpop.permute.xlu0 %538  ;;  %v1206_v16 = vld [vmem:[%s1973_s11 + $0x140] sm:$0xff] (%p1826_p5)  ;;  %v1208_v17 = vld [vmem:[%s1973_s11 + $0x148] sm:$0xff] (%p1826_p5) }
 0x188   : > { %1419 = vst.msk [vmem:[%s1973_s11 + $0xd8] sm:$0xff] %vm485_vm2, %v541_v22  ;;  %1418 = vst.msk [vmem:[%s1973_s11 + $0xd0] sm:$0xff] %vm485_vm2, %v539_v23 }
 0x189   : > { %1207 = vst [vmem:[%s2228_s10 + $0x240] sm:$0xff] (%p1826_p5), %v1206_v16  ;;  %1209 = vst [vmem:[%s2228_s10 + $0x248] sm:$0xff] (%p1826_p5), %v1208_v17 }
 0x18b   : > { %v606_v24 = vpop.permute.xlu1 %605  ;;  %v604_v25 = vpop.permute.xlu0 %603 }
 0x18c   : > { %1435 = vst.msk [vmem:[%s1973_s11 + $0x158] sm:$0xff] %vm485_vm2, %v606_v24  ;;  %1434 = vst.msk [vmem:[%s1973_s11 + $0x150] sm:$0xff] %vm485_vm2, %v604_v25  ;;  %v1222_v24 = vld [vmem:[%s1973_s11 + $0x180] sm:$0xff] (%p1826_p5)  ;;  %v1224_v25 = vld [vmem:[%s1973_s11 + $0x188] sm:$0xff] (%p1826_p5) }
 0x18d   : > { %1223 = vst [vmem:[%s2228_s10 + $0x300] sm:$0xff] (%p1826_p5), %v1222_v24  ;;  %1225 = vst [vmem:[%s2228_s10 + $0x308] sm:$0xff] (%p1826_p5), %v1224_v25 }
 0x18f   : > { %v671_v26 = vpop.permute.xlu1 %670  ;;  %v669_v27 = vpop.permute.xlu0 %668  ;;  %v1178_v2 = vld [vmem:[%s1973_s11 + $0xd0] sm:$0xff] (%p1826_p5)  ;;  %v1180_v3 = vld [vmem:[%s1973_s11 + $0xd8] sm:$0xff] (%p1826_p5) }
 0x190   : > { %1451 = vst.msk [vmem:[%s1973_s11 + $0x1d8] sm:$0xff] %vm485_vm2, %v671_v26  ;;  %1450 = vst.msk [vmem:[%s1973_s11 + $0x1d0] sm:$0xff] %vm485_vm2, %v669_v27  ;;  %v1226_v26 = vld [vmem:[%s1973_s11 + $0x190] sm:$0xff] (%p1826_p5)  ;;  %v1228_v27 = vld [vmem:[%s1973_s11 + $0x198] sm:$0xff] (%p1826_p5) }
 0x191   : > { %1179 = vst [vmem:[%s2228_s10 + $0x150] sm:$0xff] (%p1826_p5), %v1178_v2  ;;  %1181 = vst [vmem:[%s2228_s10 + $0x158] sm:$0xff] (%p1826_p5), %v1180_v3 }
 0x192   : > { %1227 = vst [vmem:[%s2228_s10 + $0x310] sm:$0xff] (%p1826_p5), %v1226_v26  ;;  %1229 = vst [vmem:[%s2228_s10 + $0x318] sm:$0xff] (%p1826_p5), %v1228_v27 }
 0x193   : > { %v545_v28 = vpop.permute.xlu1 %544  ;;  %v543_v29 = vpop.permute.xlu0 %542  ;;  %v1210_v18 = vld [vmem:[%s1973_s11 + $0x150] sm:$0xff] (%p1826_p5)  ;;  %v1212_v19 = vld [vmem:[%s1973_s11 + $0x158] sm:$0xff] (%p1826_p5) }
 0x194   : > { %1421 = vst.msk [vmem:[%s1973_s11 + $0xe8] sm:$0xff] %vm485_vm2, %v545_v28  ;;  %1420 = vst.msk [vmem:[%s1973_s11 + $0xe0] sm:$0xff] %vm485_vm2, %v543_v29  ;;  %v1230_v28 = vld [vmem:[%s1973_s11 + $0x1a0] sm:$0xff] (%p1826_p5)  ;;  %v1232_v29 = vld [vmem:[%s1973_s11 + $0x1a8] sm:$0xff] (%p1826_p5) }
 0x195   : > { %1211 = vst [vmem:[%s2228_s10 + $0x250] sm:$0xff] (%p1826_p5), %v1210_v18  ;;  %1213 = vst [vmem:[%s2228_s10 + $0x258] sm:$0xff] (%p1826_p5), %v1212_v19 }
 0x196   : > { %1231 = vst [vmem:[%s2228_s10 + $0x320] sm:$0xff] (%p1826_p5), %v1230_v28  ;;  %1233 = vst [vmem:[%s2228_s10 + $0x328] sm:$0xff] (%p1826_p5), %v1232_v29 }
 0x197   : > { %v610_v30 = vpop.permute.xlu1 %609  ;;  %v608_v31 = vpop.permute.xlu0 %607 }
 0x198   : > { %1437 = vst.msk [vmem:[%s1973_s11 + $0x168] sm:$0xff] %vm485_vm2, %v610_v30  ;;  %1436 = vst.msk [vmem:[%s1973_s11 + $0x160] sm:$0xff] %vm485_vm2, %v608_v31  ;;  %v1234_v30 = vld [vmem:[%s1973_s11 + $0x1b0] sm:$0xff] (%p1826_p5)  ;;  %v1236_v31 = vld [vmem:[%s1973_s11 + $0x1b8] sm:$0xff] (%p1826_p5) }
 0x199   : > { %1235 = vst [vmem:[%s2228_s10 + $0x330] sm:$0xff] (%p1826_p5), %v1234_v30  ;;  %1237 = vst [vmem:[%s2228_s10 + $0x338] sm:$0xff] (%p1826_p5), %v1236_v31 }
 0x19b   : > { %v675_v32 = vpop.permute.xlu1 %674  ;;  %v673_v33 = vpop.permute.xlu0 %672  ;;  %v1182_v4 = vld [vmem:[%s1973_s11 + $0xe0] sm:$0xff] (%p1826_p5)  ;;  %v1184_v5 = vld [vmem:[%s1973_s11 + $0xe8] sm:$0xff] (%p1826_p5) }
 0x19c   : > { %1453 = vst.msk [vmem:[%s1973_s11 + $0x1e8] sm:$0xff] %vm485_vm2, %v675_v32  ;;  %1452 = vst.msk [vmem:[%s1973_s11 + $0x1e0] sm:$0xff] %vm485_vm2, %v673_v33  ;;  %v1238_v32 = vld [vmem:[%s1973_s11 + $0x1c0] sm:$0xff] (%p1826_p5)  ;;  %v1240_v33 = vld [vmem:[%s1973_s11 + $0x1c8] sm:$0xff] (%p1826_p5) }
 0x19d   : > { %1183 = vst [vmem:[%s2228_s10 + $0x160] sm:$0xff] (%p1826_p5), %v1182_v4  ;;  %1185 = vst [vmem:[%s2228_s10 + $0x168] sm:$0xff] (%p1826_p5), %v1184_v5 }
 0x19e   : > { %1239 = vst [vmem:[%s2228_s10 + $0x340] sm:$0xff] (%p1826_p5), %v1238_v32  ;;  %1241 = vst [vmem:[%s2228_s10 + $0x348] sm:$0xff] (%p1826_p5), %v1240_v33 }
 0x19f   : > { %v549_v34 = vpop.permute.xlu1 %548  ;;  %v547_v35 = vpop.permute.xlu0 %546  ;;  %v1214_v20 = vld [vmem:[%s1973_s11 + $0x160] sm:$0xff] (%p1826_p5)  ;;  %v1216_v21 = vld [vmem:[%s1973_s11 + $0x168] sm:$0xff] (%p1826_p5) }
 0x1a0   : > { %1423 = vst.msk [vmem:[%s1973_s11 + $0xf8] sm:$0xff] %vm485_vm2, %v549_v34  ;;  %1422 = vst.msk [vmem:[%s1973_s11 + $0xf0] sm:$0xff] %vm485_vm2, %v547_v35  ;;  %v1242_v34 = vld [vmem:[%s1973_s11 + $0x1d0] sm:$0xff] (%p1826_p5)  ;;  %v1244_v35 = vld [vmem:[%s1973_s11 + $0x1d8] sm:$0xff] (%p1826_p5) }
 0x1a1   : > { %1215 = vst [vmem:[%s2228_s10 + $0x260] sm:$0xff] (%p1826_p5), %v1214_v20  ;;  %1217 = vst [vmem:[%s2228_s10 + $0x268] sm:$0xff] (%p1826_p5), %v1216_v21 }
 0x1a2   : > { %1243 = vst [vmem:[%s2228_s10 + $0x350] sm:$0xff] (%p1826_p5), %v1242_v34  ;;  %1245 = vst [vmem:[%s2228_s10 + $0x358] sm:$0xff] (%p1826_p5), %v1244_v35 }
 0x1a3   : > { %v614_v36 = vpop.permute.xlu1 %613  ;;  %v612_v37 = vpop.permute.xlu0 %611 }
 0x1a4   : > { %1439 = vst.msk [vmem:[%s1973_s11 + $0x178] sm:$0xff] %vm485_vm2, %v614_v36  ;;  %1438 = vst.msk [vmem:[%s1973_s11 + $0x170] sm:$0xff] %vm485_vm2, %v612_v37  ;;  %968 = sbr.rel (!%p1826_p5) target bundleno = 433 (0x1b1), region = 40  ;;  %v1246_v36 = vld [vmem:[%s1973_s11 + $0x1e0] sm:$0xff] (%p1826_p5)  ;;  %v1248_v37 = vld [vmem:[%s1973_s11 + $0x1e8] sm:$0xff] (%p1826_p5) }
 0x1a5   : > { %1247 = vst [vmem:[%s2228_s10 + $0x360] sm:$0xff] (%p1826_p5), %v1246_v36  ;;  %1249 = vst [vmem:[%s2228_s10 + $0x368] sm:$0xff] (%p1826_p5), %v1248_v37 }
 0x1a7   : > { %v679_v38 = vpop.permute.xlu1 %678  ;;  %v677_v39 = vpop.permute.xlu0 %676  ;;  %v1186_v6 = vld [vmem:[%s1973_s11 + $0xf0] sm:$0xff] (%p1826_p5)  ;;  %v1188_v7 = vld [vmem:[%s1973_s11 + $0xf8] sm:$0xff] (%p1826_p5) }
 0x1a8   : > { %1455 = vst.msk [vmem:[%s1973_s11 + $0x1f8] sm:$0xff] %vm485_vm2, %v679_v38  ;;  %1454 = vst.msk [vmem:[%s1973_s11 + $0x1f0] sm:$0xff] %vm485_vm2, %v677_v39 }
 0x1a9   : > { %1187 = vst [vmem:[%s2228_s10 + $0x170] sm:$0xff] %v1186_v6  ;;  %1189 = vst [vmem:[%s2228_s10 + $0x178] sm:$0xff] %v1188_v7 }
 0x1ab   : > { %v1218_v22 = vld [vmem:[%s1973_s11 + $0x170] sm:$0xff]  ;;  %v1220_v23 = vld [vmem:[%s1973_s11 + $0x178] sm:$0xff] }
 0x1ac   : > { %1219 = vst [vmem:[%s2228_s10 + $0x270] sm:$0xff] %v1218_v22  ;;  %1221 = vst [vmem:[%s2228_s10 + $0x278] sm:$0xff] %v1220_v23 }
 0x1af   : > { %v1250_v38 = vld [vmem:[%s1973_s11 + $0x1f0] sm:$0xff]  ;;  %v1252_v39 = vld [vmem:[%s1973_s11 + $0x1f8] sm:$0xff] }
 0x1b0   : > { %1251 = vst [vmem:[%s2228_s10 + $0x370] sm:$0xff] %v1250_v38  ;;  %1253 = vst [vmem:[%s2228_s10 + $0x378] sm:$0xff] %v1252_v39 }
 0x1b1 PF: > { %s1493_s12 = sshll.u32 %s1809_s25, 6  ;;  %s1266_s14 = sshll.u32 %s2101_s16, 4  ;;  %s1267_s14 = int_to_ptr.vmem [resolvable:$true] %s1266_s14 }
 0x1b2   : > { %s1264_s18 = scalar_lea.hbm %s2396_s5, %s1493_s12  ;;  %s1685_s19 = scalar_lea.vmem %s1267_s14, 64 }
 0x1b3   : > { %p1686_p11 = scmp.ne.s32.totalorder %s1267_s14, %s1685_s19  ;;  %s1752_s13 = smov [#allocation3]  }
 0x1b4   : > { %s1689_s26 = sshll.u32 %s1752_s13, 4  ;;  %s1690_s26 = int_to_ptr.vmem [resolvable:$false] %s1689_s26 }
 0x1b5   : > { %p1687_p12 = pnand %p1686_p11, %p1826_p5  ;;  %s1691_s11 = scalar_lea.vmem %s1690_s26, 128 }
 0x1b6   : > { %p1692_p0 = scmp.lt.s32.totalorder %s1267_s14, %s1690_s26  ;;  %p1693_p1 = scmp.lt.s32.totalorder %s1691_s11, %s1685_s19 }
 0x1b7   : > { %p1688_p13 = pneg %p1687_p12 }
 0x1b8   : > { %p1694_p2 = por %p1693_p1, %p1692_p0 }
 0x1ba   : > { %p1695_p3 = pnand %p1694_p2, %p1688_p13 }
 0x1bc   : > { %1698 = shalt.err (!%p1695_p3)
}
 0x1bd   : > { %s1699_s25 = scalar_lea.hbm %s1264_s18, 64  ;;  %s1703_s29 = scalar_lea.hbm %s2396_s5, 128 }
 0x1be   : > { %p1700_p4 = scmp.ne.s32.totalorder %s1264_s18, %s1699_s25  ;;  %p1704_p9 = scmp.lt.s32.totalorder %s1264_s18, %s2396_s5 }
 0x1bf   : > { %p1705_p10 = scmp.lt.s32.totalorder %s1703_s29, %s1699_s25 }
 0x1c0   : > { %p1701_p7 = pnand %p1700_p4, %p1826_p5 }
 0x1c1   : > { %p1706_p11 = por %p1705_p10, %p1704_p9 }
 0x1c2   : > { %p1702_p8 = pneg %p1701_p7 }
 0x1c4   : > { %p1707_p12 = pnand %p1706_p11, %p1702_p8 }
 0x1c6   : > { %1710 = shalt.err (!%p1707_p12)
}
 0x1c7   : > { %1641 = dma.vmem_to_hbm [thread:$0]  (%p1826_p5), %s1267_s14, 64, %s1264_s18, %s957_s20  }
 0x1c8 PF: > { %p1647_p13 = scmp.ge.s32.totalorder %s1745_s24, 2  ;;  %s1289_s15 = sand.u32 1, %s1733_s21  }
 0x1c9   : > { %s1290_s17 = scalar_lea.sflag [#allocation4], %s1289_s15 }
 0x1ca   : > { %p1644_p0 = pnand %p1647_p13, %p1830_p6 }
 0x1cc   : > { %p1645_p1 = pneg %p1644_p0 }
 0x1ce   : > { %1728 = dma.done.wait (%p1645_p1), %s1290_s17, 64  }
 0x1cf   : > { %1730 = vsyncadd (%p1645_p1), %s1290_s17, 4294967232  ;;  %p17_p2 = scmp.ge.s32.totalorder %s1813_s27, 4   ;;  %s2400_s21 = smov %s1737_s22 }
 0x1d0   : > { %s2401_s22 = smov %s1741_s23  ;;  %s2402_s23 = smov %s1824_s30 }
 0x1d1   : > { %s2403_s24 = smov %s1813_s27  ;;  %19 = sbr.rel (!%p17_p2) target bundleno = 3 (0x3), region = 136 }
 0x1d6   :  { %1303 = vsyncpa [#allocation4], 1 }
 0x1d7   :  { %1305 = vsyncpa [#allocation4 + $0x1], 1 }

</bundles_post_ra>
